<compile_context>
chip_gen: v7x
topology: tpu7x:2x2x1
jax: 0.10.0
libtpu: 0.0.40
codegen_flags: <defaults>
</compile_context>

<pallas_src>
import jax
import jax.numpy as jnp
from jax.experimental import pallas as pl
from jax.experimental.pallas import tpu as pltpu


def _round_up(x, m):
    return (x + m - 1) // m * m


def _dynamics_kernel(x_ref, w1_ref, b1_ref, w2_ref, b2_ref, w3_ref, b3_ref, o_ref):
    """One batch tile of:
       v = relu(x@W1 + b1) @ W2 + b2 -> relu -> @ W3 + b3 ; out = v + x[:, :num_outputs]
    """
    x = x_ref[...]                                   # (tile_b, num_inputs), x.dtype
    xb = x.astype(jnp.bfloat16)

    h = jnp.dot(xb, w1_ref[...], preferred_element_type=jnp.float32) + b1_ref[...]
    h = jnp.maximum(h, 0.0)

    h = jnp.dot(h.astype(jnp.bfloat16), w2_ref[...],
                preferred_element_type=jnp.float32) + b2_ref[...]
    h = jnp.maximum(h, 0.0)

    v = jnp.dot(h.astype(jnp.bfloat16), w3_ref[...],
                preferred_element_type=jnp.float32) + b3_ref[...]

    num_outputs = o_ref.shape[1]
    o_ref[...] = (v + x[:, :num_outputs].astype(jnp.float32)).astype(o_ref.dtype)


def prepare_params(params):
    """One-time prep: pad the hidden dim to 128 lanes (zero rows/cols stay inert
    through ReLU and the next matmul) and cast weights to bf16 (MXU-native).
    Call once per model; the result is reused across every forward call."""
    w1, b1, w2, b2, w3, b3 = params
    num_inputs, hidden_dim = w1.shape
    num_outputs = w3.shape[1]
    h_p = _round_up(hidden_dim, 128)
    wdt = jnp.bfloat16

    w1_p = jnp.zeros((num_inputs, h_p), wdt).at[:, :hidden_dim].set(w1.astype(wdt))
    w2_p = jnp.zeros((h_p, h_p), wdt).at[:hidden_dim, :hidden_dim].set(w2.astype(wdt))
    w3_p = jnp.zeros((h_p, num_outputs), wdt).at[:hidden_dim, :].set(w3.astype(wdt))
    b1_p = jnp.zeros((1, h_p), jnp.float32).at[:, :hidden_dim].set(
        b1.astype(jnp.float32).reshape(1, hidden_dim))
    b2_p = jnp.zeros((1, h_p), jnp.float32).at[:, :hidden_dim].set(
        b2.astype(jnp.float32).reshape(1, hidden_dim))
    b3_p = b3.astype(jnp.float32).reshape(1, num_outputs)
    return (w1_p, b1_p, w2_p, b2_p, w3_p, b3_p)


def deterministic_dynamics_forward(x, prepared_params, *, tile_b=None):
    """x: (B, num_inputs); prepared_params from prepare_params().
    Returns (B, num_outputs) in x.dtype."""
    w1_p, b1_p, w2_p, b2_p, w3_p, b3_p = prepared_params
    B, num_inputs = x.shape
    assert w1_p.shape[0] == num_inputs, "x feature dim must match prepared W1"
    h_p = w1_p.shape[1]
    num_outputs = w3_p.shape[1]
    assert num_outputs <= num_inputs, (
        "residual v + x[:, :num_outputs] requires num_outputs <= num_inputs")

    # Batch tile: multiple of 8 sublanes, capped at 512 rows (better HBM
    # roofline fraction than 256 while keeping >=2 grid steps for large B).
    if tile_b is None:
        tile_b = min(512, _round_up(B, 8))
    assert tile_b % 8 == 0, "tile_b must be a multiple of 8 (sublane)"
    grid = (pl.cdiv(B, tile_b),)

    flops = 2 * B * (num_inputs * h_p + h_p * h_p + h_p * num_outputs)
    bytes_accessed = (
        x.size * x.dtype.itemsize
        + B * num_outputs * x.dtype.itemsize
        + (w1_p.size + w2_p.size + w3_p.size) * 2
        + (b1_p.size + b2_p.size + b3_p.size) * 4)

    in_specs = [
        # x tile: last dim equals the full array dim -> valid block, no padding copy.
        pl.BlockSpec((tile_b, num_inputs), lambda i: (i, 0)),
        pl.BlockSpec((num_inputs, h_p), lambda i: (0, 0)),   # w1 (grid-invariant)
        pl.BlockSpec((1, h_p), lambda i: (0, 0)),            # b1
        pl.BlockSpec((h_p, h_p), lambda i: (0, 0)),          # w2
        pl.BlockSpec((1, h_p), lambda i: (0, 0)),            # b2
        pl.BlockSpec((h_p, num_outputs), lambda i: (0, 0)),  # w3
        pl.BlockSpec((1, num_outputs), lambda i: (0, 0)),    # b3
    ]
    out_spec = pl.BlockSpec((tile_b, num_outputs), lambda i: (i, 0))

    return pl.pallas_call(
        _dynamics_kernel,
        out_shape=jax.ShapeDtypeStruct((B, num_outputs), x.dtype),
        grid_spec=pl.GridSpec(grid=grid, in_specs=in_specs, out_specs=out_spec),
        compiler_params=pltpu.CompilerParams(
            dimension_semantics=("parallel",)),
        cost_estimate=pl.CostEstimate(
            flops=flops, transcendentals=0, bytes_accessed=bytes_accessed),
    )(x, w1_p, b1_p, w2_p, b2_p, w3_p, b3_p)


def init_params(key, num_inputs, num_outputs, hidden_dim=64, hidden_depth=2):
    """Init mimicking nn.Linear default (uniform +/- 1/sqrt(fan_in)).
    hidden_depth=2 -> Linear -> ReLU -> Linear -> ReLU -> Linear (module default)."""
    assert hidden_depth == 2, "this script hard-codes the default hidden_depth=2 trunk"
    dims = [(num_inputs, hidden_dim), (hidden_dim, hidden_dim), (hidden_dim, num_outputs)]
    params = []
    for (fan_in, fan_out) in dims:
        key, kw, kb = jax.random.split(key, 3)
        bound = 1.0 / jnp.sqrt(fan_in)
        w = jax.random.uniform(kw, (fan_in, fan_out), jnp.float32, -bound, bound)
        b = jax.random.uniform(kb, (1, fan_out), jnp.float32, -bound, bound)
        params += [w, b]
    return tuple(params)


def reference_forward(x, params):
    """Plain-JAX reference matching the kernel numerics (bf16 matmuls, f32 accum)."""
    w1, b1, w2, b2, w3, b3 = params

    def lin(a, w, b):
        return jnp.dot(a.astype(jnp.bfloat16), w.astype(jnp.bfloat16),
                       preferred_element_type=jnp.float32) + b

    h = jnp.maximum(lin(x, w1, b1), 0.0)
    h = jnp.maximum(lin(h, w2, b2), 0.0)
    v = lin(h, w3, b3)
    return v + x[:, : v.shape[1]]


if __name__ == "__main__":
    key = jax.random.PRNGKey(0)
    key, kx, kp = jax.random.split(key, 3)

    # small shapes consistent with the module: state/action vector input
    batch = 8
    num_inputs = 16      # e.g. obs_dim + action_dim
    num_outputs = 8      # next-state delta (<= num_inputs, required by the residual)
    hidden_dim = 32
    hidden_depth = 2

    x = jax.random.normal(kx, (batch, num_inputs), jnp.float32)
    params = init_params(kp, num_inputs, num_outputs, hidden_dim, hidden_depth)
    prepared = prepare_params(params)          # one-time weight pad + bf16 cast

    out = jax.block_until_ready(deterministic_dynamics_forward(x, prepared))
    ref = reference_forward(x, params)
    assert out.shape == (batch, num_outputs)
    assert jnp.allclose(out, ref, atol=1e-4, rtol=1e-4)

    # second check: larger batch -> 2 parallel grid steps with a partial last tile
    key, kx2, kp2 = jax.random.split(key, 3)
    x2 = jax.random.normal(kx2, (600, 24), jnp.float32)   # tile_b=512 -> grid=(2,)
    params2 = init_params(kp2, 24, 12, 64, 2)
    prepared2 = prepare_params(params2)
    out2 = jax.block_until_ready(deterministic_dynamics_forward(x2, prepared2))
    ref2 = reference_forward(x2, params2)
    assert out2.shape == (600, 12)
    assert jnp.allclose(out2, ref2, atol=1e-4, rtol=1e-4)

    print("KERNEL_OK")
</pallas_src>

<mosaic_0001>
module attributes {stable_mosaic.version = 11 : i64} {
  func.func @_dynamics_kernel(%arg0: i32, %arg1: memref<8x16xf32, #tpu.memory_space<vmem>>, %arg2: memref<16x128xbf16, #tpu.memory_space<vmem>>, %arg3: memref<1x128xf32, #tpu.memory_space<vmem>>, %arg4: memref<128x128xbf16, #tpu.memory_space<vmem>>, %arg5: memref<1x128xf32, #tpu.memory_space<vmem>>, %arg6: memref<128x8xbf16, #tpu.memory_space<vmem>>, %arg7: memref<1x8xf32, #tpu.memory_space<vmem>>, %arg8: memref<8x8xf32, #tpu.memory_space<vmem>>) attributes {dimension_semantics = [#tpu.dimension_semantics<parallel>], iteration_bounds = array<i64: 1>, scalar_prefetch = 0 : i64, scratch_operands = 0 : i64, tpu.core_type = #tpu.core_type<tc>, window_params = [{transform_indices = @transform_0, window_bounds = array<i64: 8, 16>}, {pipeline_mode = #tpu.pipeline_mode<synchronous>, transform_indices = @transform_1, window_bounds = array<i64: 16, 128>}, {pipeline_mode = #tpu.pipeline_mode<synchronous>, transform_indices = @transform_2, window_bounds = array<i64: 1, 128>}, {pipeline_mode = #tpu.pipeline_mode<synchronous>, transform_indices = @transform_3, window_bounds = array<i64: 128, 128>}, {pipeline_mode = #tpu.pipeline_mode<synchronous>, transform_indices = @transform_4, window_bounds = array<i64: 1, 128>}, {pipeline_mode = #tpu.pipeline_mode<synchronous>, transform_indices = @transform_5, window_bounds = array<i64: 128, 8>}, {pipeline_mode = #tpu.pipeline_mode<synchronous>, transform_indices = @transform_6, window_bounds = array<i64: 1, 8>}, {transform_indices = @transform_7, window_bounds = array<i64: 8, 8>}]} {
    %c0 = arith.constant 0 : index
    %c0_0 = arith.constant 0 : index
    %0 = vector.load %arg1[%c0, %c0_0] : memref<8x16xf32, #tpu.memory_space<vmem>>, vector<8x16xf32>
    %1 = arith.truncf %0 : vector<8x16xf32> to vector<8x16xbf16>
    %c0_1 = arith.constant 0 : index
    %c0_2 = arith.constant 0 : index
    %2 = vector.load %arg2[%c0_1, %c0_2] : memref<16x128xbf16, #tpu.memory_space<vmem>>, vector<16x128xbf16>
    %cst = arith.constant dense<0.000000e+00> : vector<8x128xf32>
    %3 = tpu.matmul %1, %2, %cst {dimension_numbers = #tpu.dot_dimension_numbers<[1], [0], [0], [1], [0, 0, 1, 1], [], []>} : vector<8x16xbf16>, vector<16x128xbf16>, vector<8x128xf32> -> vector<8x128xf32>
    %c0_3 = arith.constant 0 : index
    %c0_4 = arith.constant 0 : index
    %4 = vector.load %arg3[%c0_3, %c0_4] : memref<1x128xf32, #tpu.memory_space<vmem>>, vector<1x128xf32>
    %5 = vector.broadcast %4 : vector<1x128xf32> to vector<8x128xf32>
    %6 = arith.addf %3, %5 : vector<8x128xf32>
    %cst_5 = arith.constant 0.000000e+00 : f32
    %7 = vector.broadcast %cst_5 : f32 to vector<8x128xf32>
    %8 = arith.maximumf %6, %7 : vector<8x128xf32>
    %9 = arith.truncf %8 : vector<8x128xf32> to vector<8x128xbf16>
    %c0_6 = arith.constant 0 : index
    %c0_7 = arith.constant 0 : index
    %10 = vector.load %arg4[%c0_6, %c0_7] : memref<128x128xbf16, #tpu.memory_space<vmem>>, vector<128x128xbf16>
    %cst_8 = arith.constant dense<0.000000e+00> : vector<8x128xf32>
    %11 = tpu.matmul %9, %10, %cst_8 {dimension_numbers = #tpu.dot_dimension_numbers<[1], [0], [0], [1], [0, 0, 1, 1], [], []>} : vector<8x128xbf16>, vector<128x128xbf16>, vector<8x128xf32> -> vector<8x128xf32>
    %c0_9 = arith.constant 0 : index
    %c0_10 = arith.constant 0 : index
    %12 = vector.load %arg5[%c0_9, %c0_10] : memref<1x128xf32, #tpu.memory_space<vmem>>, vector<1x128xf32>
    %13 = vector.broadcast %12 : vector<1x128xf32> to vector<8x128xf32>
    %14 = arith.addf %11, %13 : vector<8x128xf32>
    %cst_11 = arith.constant 0.000000e+00 : f32
    %15 = vector.broadcast %cst_11 : f32 to vector<8x128xf32>
    %16 = arith.maximumf %14, %15 : vector<8x128xf32>
    %17 = arith.truncf %16 : vector<8x128xf32> to vector<8x128xbf16>
    %c0_12 = arith.constant 0 : index
    %c0_13 = arith.constant 0 : index
    %18 = vector.load %arg6[%c0_12, %c0_13] : memref<128x8xbf16, #tpu.memory_space<vmem>>, vector<128x8xbf16>
    %cst_14 = arith.constant dense<0.000000e+00> : vector<8x8xf32>
    %19 = tpu.matmul %17, %18, %cst_14 {dimension_numbers = #tpu.dot_dimension_numbers<[1], [0], [0], [1], [0, 0, 1, 1], [], []>} : vector<8x128xbf16>, vector<128x8xbf16>, vector<8x8xf32> -> vector<8x8xf32>
    %c0_15 = arith.constant 0 : index
    %c0_16 = arith.constant 0 : index
    %20 = vector.load %arg7[%c0_15, %c0_16] : memref<1x8xf32, #tpu.memory_space<vmem>>, vector<1x8xf32>
    %21 = vector.broadcast %20 : vector<1x8xf32> to vector<8x8xf32>
    %22 = arith.addf %19, %21 : vector<8x8xf32>
    %23 = vector.extract_strided_slice %0 {offsets = [0, 0], sizes = [8, 8], strides = [1, 1]} : vector<8x16xf32> to vector<8x8xf32>
    %24 = arith.addf %22, %23 : vector<8x8xf32>
    %c0_17 = arith.constant 0 : index
    %c0_18 = arith.constant 0 : index
    %25 = vector.load %arg8[%c0_17, %c0_18] : memref<8x8xf32, #tpu.memory_space<vmem>>, vector<8x8xf32>
    tpu.vector_store %arg8[%c0_17, %c0_18], %24 {strides = array<i32>} : memref<8x8xf32, #tpu.memory_space<vmem>>, vector<8x8xf32>,
    return
  }
  func.func @transform_0(%arg0: i32) -> (i32, i32) {
    %c0_i32 = arith.constant 0 : i32
    %c0_i32_0 = arith.constant 0 : i32
    return %arg0, %c0_i32 : i32, i32
  }
  func.func @transform_1(%arg0: i32) -> (i32, i32) {
    %c0_i32 = arith.constant 0 : i32
    %c0_i32_0 = arith.constant 0 : i32
    %c0_i32_1 = arith.constant 0 : i32
    return %c0_i32, %c0_i32_0 : i32, i32
  }
  func.func @transform_2(%arg0: i32) -> (i32, i32) {
    %c0_i32 = arith.constant 0 : i32
    %c0_i32_0 = arith.constant 0 : i32
    %c0_i32_1 = arith.constant 0 : i32
    return %c0_i32, %c0_i32_0 : i32, i32
  }
  func.func @transform_3(%arg0: i32) -> (i32, i32) {
    %c0_i32 = arith.constant 0 : i32
    %c0_i32_0 = arith.constant 0 : i32
    %c0_i32_1 = arith.constant 0 : i32
    return %c0_i32, %c0_i32_0 : i32, i32
  }
  func.func @transform_4(%arg0: i32) -> (i32, i32) {
    %c0_i32 = arith.constant 0 : i32
    %c0_i32_0 = arith.constant 0 : i32
    %c0_i32_1 = arith.constant 0 : i32
    return %c0_i32, %c0_i32_0 : i32, i32
  }
  func.func @transform_5(%arg0: i32) -> (i32, i32) {
    %c0_i32 = arith.constant 0 : i32
    %c0_i32_0 = arith.constant 0 : i32
    %c0_i32_1 = arith.constant 0 : i32
    return %c0_i32, %c0_i32_0 : i32, i32
  }
  func.func @transform_6(%arg0: i32) -> (i32, i32) {
    %c0_i32 = arith.constant 0 : i32
    %c0_i32_0 = arith.constant 0 : i32
    %c0_i32_1 = arith.constant 0 : i32
    return %c0_i32, %c0_i32_0 : i32, i32
  }
  func.func @transform_7(%arg0: i32) -> (i32, i32) {
    %c0_i32 = arith.constant 0 : i32
    %c0_i32_0 = arith.constant 0 : i32
    return %arg0, %c0_i32 : i32, i32
  }
}

</mosaic_0001>

<bundles_post_ra>
// kernel: tpu_custom_call.1
= control target key start
LH: loop header
LB: loop body
LE: loop exit
PB: predicated region body
PF: predicated region fallthrough
CT: control target
= control target key end

     0   :  { %12 = vsyncpa [#allocation3], 0  ;;  %s660_s0 = inlined_call_operand.vmem [shape: f32[8,16], index: 0, kind: input, shape index: {}]   ;;  %s661_s1 = inlined_call_operand.hbm [shape: bf16[16,128], index: 1, kind: input, shape index: {}]   ;;  %s662_s2 = inlined_call_operand.vmem [shape: f32[1,128], index: 2, kind: input, shape index: {}]   ;;  %s663_s3 = inlined_call_operand.vmem [shape: bf16[128,128], index: 3, kind: input, shape index: {}]   ;;  %s664_s4 = inlined_call_operand.vmem [shape: f32[1,128], index: 4, kind: input, shape index: {}]   ;;  %s665_s5 = inlined_call_operand.vmem [shape: bf16[128,8], index: 5, kind: input, shape index: {}]   ;;  %s666_s6 = inlined_call_operand.vmem [shape: f32[1,8], index: 6, kind: input, shape index: {}]   ;;  %s667_s7 = inlined_call_operand.hbm [shape: f32[8,8], index: 7, kind: output, shape index: {}]  }
   0x1   :  { %13 = vsyncpa [#allocation4], 0  ;;  %s505_s24 = smov [#allocation2]   ;;  %s457_s28 = scalar_lea.hbm %s661_s1, 128 }
   0x2   :  { %s21_s25 = sshll.u32 %s505_s24, 4  ;;  %p458_p0 = scmp.ne.s32.totalorder %s661_s1, %s457_s28  ;;  %s22_s25 = int_to_ptr.vmem [resolvable:$true] %s21_s25 }
   0x3   :  { %p461_p1 = scmp.lt.u32.totalorder %s457_s28, %s661_s1 }
   0x5   :  { %p463_p2 = pnand %p461_p1, %p458_p0 }
   0x7   :  { %466 = shalt.err (!%p463_p2)
}
   0x8   :  { %s467_s10 = scalar_lea.vmem %s22_s25, 128  ;;  %p472_p4 = scmp.lt.s32.totalorder %s22_s25, %s22_s25 }
   0x9   :  { %p468_p3 = scmp.ne.s32.totalorder %s22_s25, %s467_s10  ;;  %p473_p5 = scmp.lt.s32.totalorder %s467_s10, %s467_s10 }
   0xb   :  { %p474_p6 = por %p473_p5, %p472_p4 }
   0xd   :  { %p475_p7 = pnand %p474_p6, %p468_p3 }
   0xf   :  { %478 = shalt.err (!%p475_p7)
}
  0x10   :  { %s506_s11 = smov 64   ;;  %s507_s12 = smov 4  }
  0x11   :  { %27 = dma.hbm_to_vmem [thread:$0]  %s661_s1, 128, %s22_s25, [#allocation3], %s506_s11, %s506_s11, %s507_s12  }
  0x12   :  { %501 = dma.done.wait [#allocation3], 128  }
  0x13   :  { %502 = vsyncadd [#allocation3], 4294967168  ;;  %v508_v0 = vmov 0.0   ;;  %vm509_vm0 = vmmov 0   ;;  %v440_v1 = vld [vmem:[#allocation2] sm:$0xff]   ;;  %vm59_vm1 = vcmask 130048  }
  0x14   :  { %388 = vmatprep.subr.bf16.mxu0 %v508_v0  ;;  %390 = vmatprep.mubr.msk.bf16.mxu0 %vm509_vm0, %v508_v0  ;;  %v570_v2 = vld [vmem:[%s660_s0] sm:$0xff]  ;;  %v442_v5 = vld [vmem:[%s663_s3 + $0x8] sm:$0xff]   ;;  %v443_v6 = vld [vmem:[%s663_s3 + $0x10] sm:$0xff]   ;;  %s510_s26 = smov [#allocation5]   ;;  %vm330_vm2 = vcmask 64512  }
  0x15   :  { %394 = vmatprep.subr.bf16.mxu1 %v508_v0  ;;  %410 = vmatprep.mubr.msk.bf16.mxu1 %vm509_vm0, %v508_v0  ;;  %v43_v3 = vpack.c.bf16 %v570_v2, %v570_v2  ;;  %v441_v4 = vld [vmem:[%s663_s3] sm:$0xff]   ;;  %v444_v7 = vld [vmem:[%s663_s3 + $0x18] sm:$0xff]   ;;  %v446_v9 = vld [vmem:[%s663_s3 + $0x28] sm:$0xff]  }
  0x16   :  { %389 = vmatpush3.bf16.msra.mxu0 %v440_v1  ;;  %395 = vmatpush3.bf16.msra.mxu1 %v441_v4  ;;  %v445_v8 = vld [vmem:[%s663_s3 + $0x20] sm:$0xff]   ;;  %v447_v10 = vld [vmem:[%s663_s3 + $0x30] sm:$0xff]   ;;  %v448_v11 = vld [vmem:[%s663_s3 + $0x38] sm:$0xff]  }
  0x17   :  { %414 = vmatprep.subr.bf16.mxu0 %v508_v0  ;;  %396 = vmatprep.subr.bf16.mxu1 %v508_v0  ;;  %v449_v12 = vld [vmem:[%s665_s5] sm:$0xff]   ;;  %v450_v13 = vld [vmem:[%s665_s5 + $0x8] sm:$0xff]   ;;  %v451_v14 = vld [vmem:[%s665_s5 + $0x10] sm:$0xff]  }
  0x18   :  { %v452_v15 = vld [vmem:[%s665_s5 + $0x18] sm:$0xff]   ;;  %v453_v16 = vld [vmem:[%s665_s5 + $0x20] sm:$0xff]   ;;  %v454_v17 = vld [vmem:[%s665_s5 + $0x28] sm:$0xff]  }
  0x19   :  { %391 = vmatmul.mubr.msk.bf16.vlgmr.msra.gmra.mrb[0].mxu0 %vm59_vm1, %v43_v3  ;;  %v347_v18 = vld [vmem:[%s662_s2] ss:$0 sm:$0xff]  ;;  %v455_v26 = vld [vmem:[%s665_s5 + $0x30] sm:$0xff]   ;;  %v456_v27 = vld [vmem:[%s665_s5 + $0x38] sm:$0xff]   ;;  %s338_s5 = sshll.u32 %s510_s26, 4  ;;  %s339_s5 = int_to_ptr.vmem [resolvable:$true] %s338_s5 }
  0x1a   :  { %430 = vmatprep.mubr.msk.bf16.mxu0 %vm509_vm0, %v508_v0  ;;  %397 = vmatpush3.bf16.msra.mxu1 %v442_v5  ;;  %v350_v28 = vld [vmem:[%s664_s4] ss:$0 sm:$0xff]  ;;  %s479_s4 = scalar_lea.vmem %s339_s5, 128  ;;  %p484_p9 = scmp.lt.s32.totalorder %s339_s5, %s339_s5 }
  0x1b   :  { %398 = vmatprep.subr.bf16.mxu1 %v508_v0  ;;  %415 = vmatpush3.bf16.msra.mxu0 %v449_v12  ;;  %v359_v36 = vld [vmem:[%s666_s6] ss:$0 sm:$0xff]  ;;  %p480_p8 = scmp.ne.s32.totalorder %s339_s5, %s479_s4  ;;  %p485_p10 = scmp.lt.s32.totalorder %s479_s4, %s479_s4 }
  0x1c   :  { %416 = vmatprep.subr.bf16.mxu0 %v508_v0 }
  0x1d   :  { %p486_p11 = por %p485_p10, %p484_p9 }
  0x1e   :  { %399 = vmatpush3.bf16.msra.mxu1 %v443_v6 }
  0x1f   :  { %400 = vmatprep.subr.bf16.mxu1 %v508_v0  ;;  %417 = vmatpush3.bf16.msra.mxu0 %v450_v13  ;;  %p487_p12 = pnand %p486_p11, %p480_p8 }
  0x20   :  { %418 = vmatprep.subr.bf16.mxu0 %v508_v0 }
  0x22   :  { %401 = vmatpush3.bf16.msra.mxu1 %v444_v7 }
  0x23   :  { %402 = vmatprep.subr.bf16.mxu1 %v508_v0  ;;  %419 = vmatpush3.bf16.msra.mxu0 %v451_v14 }
  0x24   :  { %420 = vmatprep.subr.bf16.mxu0 %v508_v0 }
  0x26   :  { %403 = vmatpush3.bf16.msra.mxu1 %v445_v8 }
  0x27   :  { %404 = vmatprep.subr.bf16.mxu1 %v508_v0  ;;  %421 = vmatpush3.bf16.msra.mxu0 %v452_v15 }
  0x28   :  { %422 = vmatprep.subr.bf16.mxu0 %v508_v0 }
  0x2a   :  { %405 = vmatpush3.bf16.msra.mxu1 %v446_v9 }
  0x2b   :  { %406 = vmatprep.subr.bf16.mxu1 %v508_v0  ;;  %423 = vmatpush3.bf16.msra.mxu0 %v453_v16 }
  0x2c   :  { %424 = vmatprep.subr.bf16.mxu0 %v508_v0 }
  0x2e   :  { %407 = vmatpush3.bf16.msra.mxu1 %v447_v10 }
  0x2f   :  { %408 = vmatprep.subr.bf16.mxu1 %v508_v0  ;;  %425 = vmatpush3.bf16.msra.mxu0 %v454_v17 }
  0x30   :  { %426 = vmatprep.subr.bf16.mxu0 %v508_v0 }
  0x32   :  { %409 = vmatpush3.bf16.msra.mxu1 %v448_v11 }
  0x33   :  { %427 = vmatpush3.bf16.msra.mxu0 %v455_v26 }
  0x34   :  { %428 = vmatprep.subr.bf16.mxu0 %v508_v0 }
  0x37   :  { %429 = vmatpush3.bf16.msra.mxu0 %v456_v27 }
  0xec   :  { %v97_v19 = vpop.f32.mrb[0].mxu0 }
  0xed   :  { %v98_v20 = vadd.f32 %v347_v18, %v97_v19  ;;  %v392_v21 = vpop.f32.mrb[1].mxu0 }
  0xee   :  { %v100_v22 = vpop.f32.mrb[2].mxu0 }
  0xef   :  { %v103_v23 = vmax.f32 %v98_v20, 0.0  ;;  %v393_v24 = vpop.f32.mrb[3].mxu0 }
  0xf1   :  { %v104_v25 = vpack.c.bf16 %v103_v23, %v103_v23 }
  0xf3   :  { %411 = vmatmul.mubr.bf16.vlgmr.msra.gmra.mrb[0].mxu1 %v104_v25 }
 0x1c6   :  { %v210_v29 = vpop.f32.mrb[0].mxu1 }
 0x1c7   :  { %v211_v30 = vadd.f32 %v350_v28, %v210_v29  ;;  %v412_v31 = vpop.f32.mrb[1].mxu1 }
 0x1c8   :  { %v213_v32 = vpop.f32.mrb[2].mxu1 }
 0x1c9   :  { %v216_v33 = vmax.f32 %v211_v30, 0.0  ;;  %v413_v34 = vpop.f32.mrb[3].mxu1 }
 0x1cb   :  { %v217_v35 = vpack.c.bf16 %v216_v33, %v216_v33 }
 0x1cd   :  { %431 = vmatmul.mubr.bf16.vlgmr.msra.gmra.mrb[4].mxu0 %v217_v35 }
 0x2a0   :  { %v323_v37 = vpop.f32.mrb[4].mxu0 }
 0x2a1   :  { %v324_v38 = vadd.f32 %v359_v36, %v323_v37  ;;  %v432_v39 = vpop.f32.mrb[5].mxu0 }
 0x2a2   :  { %v326_v40 = vpop.f32.mrb[6].mxu0 }
 0x2a3   :  { %v329_v41 = vadd.f32 %v324_v38, %v570_v2  ;;  %v433_v42 = vpop.f32.mrb[7].mxu0 }
 0x2a5   :  { %331 = vst.msk [vmem:[#allocation5] sm:$0xff] %vm330_vm2, %v329_v41 }
 0x2a6   :  { %490 = shalt.err (!%p487_p12)
}
 0x2a7   :  { %s491_s28 = scalar_lea.hbm %s667_s7, 128 }
 0x2a8   :  { %p492_p13 = scmp.ne.s32.totalorder %s667_s7, %s491_s28  ;;  %p495_p0 = scmp.lt.u32.totalorder %s491_s28, %s667_s7 }
 0x2aa   :  { %p497_p1 = pnand %p495_p0, %p492_p13 }
 0x2ac   :  { %500 = shalt.err (!%p497_p1)
}
 0x2ad   :  { %341 = dma.vmem_to_hbm [thread:$0]  %s339_s5, 128, %s667_s7, [#allocation4]  }
 0x2ae   :  { %503 = dma.done.wait [#allocation4], 128  }
 0x2af   :  { %504 = vsyncadd [#allocation4], 4294967168 }
 0x2b0   :  { %345 = vsyncpa [#allocation3], 1 }
 0x2b1   :  { %346 = vsyncpa [#allocation4], 1 }

</bundles_post_ra>
